<compile_context>
chip_gen: v6e
topology: v6e:2x2x1
jax: 0.10.0
libtpu: 0.0.40
codegen_flags: <defaults>
</compile_context>

<pallas_src>
import jax
import jax.numpy as jnp
from jax.experimental import pallas as pl
from jax.experimental.pallas import tpu as pltpu


def _feature_joint_kernel(a_ref, b_ref, out_ref):
    # a_ref : (bb, Na, Da)   b_ref : (bb, Nb, Db)   out_ref : (bb, Na+Nb, Da+Db)
    bb, Na, Da = a_ref.shape
    _, Nb, Db = b_ref.shape
    dt = out_ref.dtype

    a = a_ref[...].astype(dt)
    b = b_ref[...].astype(dt)

    # Build the full block-diagonal tile in registers (static zero shapes; no
    # reads of uninitialized output memory), then write it with ONE store.
    top = jnp.concatenate([a, jnp.zeros((bb, Na, Db), dt)], axis=2)
    bot = jnp.concatenate([jnp.zeros((bb, Nb, Da), dt), b], axis=2)
    out_ref[...] = jnp.concatenate([top, bot], axis=1)


def _vmem_budget_bytes():
    """(per-step target bytes, vmem_limit_bytes) sized per TPU generation."""
    try:
        cap = int(pltpu.get_tpu_info().vmem_capacity_bytes)
    except Exception:
        cap = 64 << 20  # be conservative (assume v7x-sized VMEM)
    if cap <= (64 << 20):
        # v7x: 64 MiB physical VMEM; keep double-buffered footprint well under
        # the raised scoped limit.
        return 8 << 20, 32 << 20
    # v5e / v6e: 128 MiB physical; bigger blocks amortize per-step overhead.
    return 12 << 20, 48 << 20


def _choose_batch_block(B, per_batch_bytes, target_bytes):
    """Batch block size; no divisibility requirement (ragged last block ok)."""
    bb = max(1, min(B, target_bytes // max(per_batch_bytes, 1)))
    if B >= 2:
        # Keep >= 2 grid steps so megacore ("parallel") can split the copy.
        bb = min(bb, pl.cdiv(B, 2))
    return int(bb)


def _feature_joint_xla(feature_a, feature_b):
    """Plain-XLA path (also the correctness reference)."""
    B, Na, Da = feature_a.shape
    _, Nb, Db = feature_b.shape
    dt = jnp.result_type(feature_a.dtype, feature_b.dtype)
    top = jnp.concatenate(
        [feature_a.astype(dt), jnp.zeros((B, Na, Db), dt)], axis=2)
    bot = jnp.concatenate(
        [jnp.zeros((B, Nb, Da), dt), feature_b.astype(dt)], axis=2)
    return jnp.concatenate([top, bot], axis=1)


def feature_joint(feature_a: jax.Array, feature_b: jax.Array,
                  *, force_pallas: bool = False) -> jax.Array:
    """Pallas implementation of Feature_Joint.forward."""
    assert feature_a.shape[0] == feature_b.shape[0], "batch dims must match"
    B, Na, Da = feature_a.shape
    _, Nb, Db = feature_b.shape
    out_dtype = jnp.result_type(feature_a.dtype, feature_b.dtype)
    No, Do = Na + Nb, Da + Db

    itemsize = jnp.dtype(out_dtype).itemsize
    per_batch_bytes = (No * Do + Na * Da + Nb * Db) * itemsize
    total_bytes = B * per_batch_bytes

    # Tiny relayouts: pallas_call launch + per-step overhead dominates; let
    # XLA fuse the pad/concat for free.
    if not force_pallas and total_bytes < (1 << 20):
        return _feature_joint_xla(feature_a, feature_b)

    target_bytes, vmem_limit = _vmem_budget_bytes()
    bb = _choose_batch_block(B, per_batch_bytes, target_bytes)
    grid = (pl.cdiv(B, bb),)

    return pl.pallas_call(
        _feature_joint_kernel,
        out_shape=jax.ShapeDtypeStruct((B, No, Do), out_dtype),
        grid=grid,
        in_specs=[
            # Last two block dims equal the full array dims, so the (8,128)
            # tiling constraint is satisfied for any Na/Da/Nb/Db.  Leading
            # (batch) dim may be ragged on the last grid step.
            pl.BlockSpec((bb, Na, Da), lambda i: (i, 0, 0)),
            pl.BlockSpec((bb, Nb, Db), lambda i: (i, 0, 0)),
        ],
        out_specs=pl.BlockSpec((bb, No, Do), lambda i: (i, 0, 0)),
        compiler_params=pltpu.CompilerParams(
            dimension_semantics=("parallel",),
            vmem_limit_bytes=vmem_limit,
        ),
        cost_estimate=pl.CostEstimate(
            flops=0, transcendentals=0, bytes_accessed=total_bytes),
    )(feature_a, feature_b)


if __name__ == "__main__":
    key = jax.random.PRNGKey(0)
    ka, kb = jax.random.split(key)

    # Small shapes consistent with the forward: (B, N, D) point-feature sets.
    feature_a = jax.random.normal(ka, (2, 8, 32), dtype=jnp.float32)
    feature_b = jax.random.normal(kb, (2, 6, 16), dtype=jnp.float32)

    ref = _feature_joint_xla(feature_a, feature_b)

    # Exercise the Pallas kernel explicitly (the auto path would take the
    # small-size XLA fallback at these shapes).
    out = feature_joint(feature_a, feature_b, force_pallas=True)
    out = jax.block_until_ready(out)
    assert out.shape == (2, 8 + 6, 32 + 16), out.shape
    assert jnp.allclose(out, ref), "pallas path mismatch vs reference"

    # Auto path (XLA fallback for tiny inputs) must agree as well.
    out_auto = jax.block_until_ready(feature_joint(feature_a, feature_b))
    assert jnp.allclose(out_auto, ref), "auto path mismatch vs reference"

    print("KERNEL_OK")
</pallas_src>

<mosaic_0001>
module attributes {stable_mosaic.version = 11 : i64} {
  func.func @_feature_joint_kernel(%arg0: i32, %arg1: memref<1x8x32xf32, #tpu.memory_space<vmem>>, %arg2: memref<1x6x16xf32, #tpu.memory_space<vmem>>, %arg3: memref<1x14x48xf32, #tpu.memory_space<vmem>>) attributes {dimension_semantics = [#tpu.dimension_semantics<parallel>], iteration_bounds = array<i64: 2>, scalar_prefetch = 0 : i64, scratch_operands = 0 : i64, tpu.core_type = #tpu.core_type<tc>, window_params = [{transform_indices = @transform_0, window_bounds = array<i64: 1, 8, 32>}, {transform_indices = @transform_1, window_bounds = array<i64: 1, 6, 16>}, {transform_indices = @transform_2, window_bounds = array<i64: 1, 14, 48>}]} {
    %c0 = arith.constant 0 : index
    %c0_0 = arith.constant 0 : index
    %c0_1 = arith.constant 0 : index
    %0 = vector.load %arg1[%c0, %c0_0, %c0_1] : memref<1x8x32xf32, #tpu.memory_space<vmem>>, vector<1x8x32xf32>
    %c0_2 = arith.constant 0 : index
    %c0_3 = arith.constant 0 : index
    %c0_4 = arith.constant 0 : index
    %1 = vector.load %arg2[%c0_2, %c0_3, %c0_4] : memref<1x6x16xf32, #tpu.memory_space<vmem>>, vector<1x6x16xf32>
    %cst = arith.constant 0.000000e+00 : f32
    %2 = vector.broadcast %cst : f32 to vector<1x8x16xf32>
    %3 = tpu.concatenate %0, %2 in 2 : vector<1x8x32xf32>, vector<1x8x16xf32> -> vector<1x8x48xf32>
    %cst_5 = arith.constant 0.000000e+00 : f32
    %4 = vector.broadcast %cst_5 : f32 to vector<1x6x32xf32>
    %5 = tpu.concatenate %4, %1 in 2 : vector<1x6x32xf32>, vector<1x6x16xf32> -> vector<1x6x48xf32>
    %6 = tpu.concatenate %3, %5 in 1 : vector<1x8x48xf32>, vector<1x6x48xf32> -> vector<1x14x48xf32>
    %c0_6 = arith.constant 0 : index
    %c0_7 = arith.constant 0 : index
    %c0_8 = arith.constant 0 : index
    %7 = vector.load %arg3[%c0_6, %c0_7, %c0_8] : memref<1x14x48xf32, #tpu.memory_space<vmem>>, vector<1x14x48xf32>
    tpu.vector_store %arg3[%c0_6, %c0_7, %c0_8], %6 {strides = array<i32>} : memref<1x14x48xf32, #tpu.memory_space<vmem>>, vector<1x14x48xf32>,
    return
  }
  func.func @transform_0(%arg0: i32) -> (i32, i32, i32) {
    %c0_i32 = arith.constant 0 : i32
    %c0_i32_0 = arith.constant 0 : i32
    %c0_i32_1 = arith.constant 0 : i32
    return %arg0, %c0_i32, %c0_i32_0 : i32, i32, i32
  }
  func.func @transform_1(%arg0: i32) -> (i32, i32, i32) {
    %c0_i32 = arith.constant 0 : i32
    %c0_i32_0 = arith.constant 0 : i32
    %c0_i32_1 = arith.constant 0 : i32
    return %arg0, %c0_i32, %c0_i32_0 : i32, i32, i32
  }
  func.func @transform_2(%arg0: i32) -> (i32, i32, i32) {
    %c0_i32 = arith.constant 0 : i32
    %c0_i32_0 = arith.constant 0 : i32
    %c0_i32_1 = arith.constant 0 : i32
    return %arg0, %c0_i32, %c0_i32_0 : i32, i32, i32
  }
}

</mosaic_0001>

<bundles_post_ra>
// kernel: tpu_custom_call.1
= control target key start
LH: loop header
LB: loop body
LE: loop exit
PB: predicated region body
PF: predicated region fallthrough
CT: control target
= control target key end

     0   :  { %s283_s9 = smov 0   ;;  %s297_s0 = inlined_call_operand.vmem [shape: f32[2,8,32], index: 0, kind: input, shape index: {}]   ;;  %s298_s1 = inlined_call_operand.vmem [shape: f32[2,6,16], index: 1, kind: input, shape index: {}]   ;;  %s299_s2 = inlined_call_operand.vmem [shape: f32[2,14,48], index: 2, kind: output, shape index: {}]  }
   0x1 LB: > { %s238_s10 = sadd.s32 4294967295, %s265_s9   ;;  %p242_p0 = scmp.ge.s32.totalorder %s265_s9, 1  ;;  %s265_s9 = sphi %s283_s9, %s12_s9  }
   0x2   : > { %p120_p1 = scmp.lt.s32.totalorder %s265_s9, 3 }
   0x4   : > { %p121_p2 = pnand %p242_p0, %p120_p1 }
   0x5   : > { %p145_p3 = scmp.lt.s32.totalorder (!%p121_p2), %s238_s10, 1  ;;  %s267_s22 = smov (!%p121_p2), 32  }
   0x6   : > { %124 = sbr.rel (%p121_p2) target bundleno = 133 (0x85), region = 28 }
   0xb   : > { %s301_s10 = smov (!%p145_p3, %s238_s10), 1  ;;  %vm160_vm0 = vcmask 261120   ;;  %vm167_vm1 = vcmask 392192   ;;  %vm169_vm2 = vcmask 390144  }
   0xc   : > { %s243_s11 = sshll.u32 %s301_s10, 3  ;;  %s249_s12 = sshll.u32 %s301_s10, 4 }
   0xd   : > { %s148_s15 = scalar_lea.vmem %s297_s0, %s243_s11  ;;  %s152_s18 = scalar_lea.vmem %s298_s1, %s243_s11 }
   0xe   : > { %v158_v0 = vld [vmem:[%s148_s15] sm:$0xff]  ;;  %s157_s21 = scalar_lea.vmem %s299_s2, %s249_s12 }
   0xf   : > { %v159_v1 = vld [vmem:[%s152_s18] sm:$0x3f]  ;;  %v161_v2 = vsel %vm160_vm0, %v158_v0, 0.0 }
  0x10   : > { %163 = vrot.lane.b32.xlu0 %v159_v1, %s267_s22  ;;  %168 = vst.msk [vmem:[%s157_s21] sm:$0xff] %vm167_vm1, %v161_v2 }
  0x82   : > { %v164_v3 = vpop.permute.xlu0 %163 }
  0x83   : > { %v166_v4 = vsel %vm160_vm0, 0.0, %v164_v3 }
  0x84   : > { %170 = vst.msk [vmem:[%s157_s21 + $0x8] sm:$0x3f] %vm169_vm2, %v166_v4 }
  0x85 PF: > { %s12_s9 = sadd.s32 1, %s265_s9  }
  0x86   : > { %p9_p4 = scmp.ge.s32.totalorder %s12_s9, 4  }
  0x88   :  { %11 = sbr.rel (!%p9_p4) target bundleno = 1 (0x1), region = 61 }

</bundles_post_ra>
